<compile_context>
chip_gen: v7x
topology: tpu7x:2x2x1
jax: 0.10.0
libtpu: 0.0.40
codegen_flags: <defaults>
</compile_context>

<pallas_src>
import itertools

import jax
import jax.numpy as jnp
from jax.experimental import pallas as pl
from jax.experimental.pallas import tpu as pltpu


def _make_sisdr_kernel(perms, n_sources, eps, zero_mean, tb, T):
    """Kernel over one (TB, S, T) tile of batch elements.

    Computes the full S x S pairwise SI-SNR matrix per batch element via the
    Gram-matrix closed form, scores every permutation (mean over target
    sources), and emits the best score + best permutation index per element.
    """
    S = n_sources
    P = len(perms)
    inv_S = 1.0 / float(S)

    def kernel(pr_ref, t_ref, best_ref, perm_ref):
        pr = pr_ref[...]   # (tb, S, T) f32
        t = t_ref[...]     # (tb, S, T) f32

        # ---- Gram-matrix closed form: one batched MXU matmul + 2 reductions.
        # cross[b, i, j] = sum_t pr[b, i, t] * t[b, j, t]
        cross = jnp.einsum('bit,bjt->bij', pr, t,
                           preferred_element_type=jnp.float32)   # (tb, S, S)
        ttd = jnp.sum(t * t, axis=-1)                             # (tb, S)
        ppd = jnp.sum(pr * pr, axis=-1)                           # (tb, S)

        if zero_mean:
            # Fold zero-mean into the sums instead of materializing centered
            # copies: sum((x-mx)(y-my)) = sum(xy) - sum(x)*sum(y)/T.
            sp = jnp.sum(pr, axis=-1)                             # (tb, S)
            st = jnp.sum(t, axis=-1)                              # (tb, S)
            inv_T = 1.0 / float(T)
            cross = cross - sp[:, :, None] * st[:, None, :] * inv_T
            ttd = ttd - st * st * inv_T
            ppd = ppd - sp * sp * inv_T

        ttd_b = ttd[:, None, :]                                   # broadcast over i
        alpha = cross / (ttd_b + eps)                             # (tb, S, S)
        num = alpha * alpha * ttd_b                               # ||s_t||^2
        den = ppd[:, :, None] - 2.0 * alpha * cross + num + eps   # ||e_t||^2 + eps
        sisnr = 10.0 * jnp.log10(num / den)                       # (tb, S, S)

        # ---- Permutation scoring, vectorized over the tb batch elements.
        # score[p] = mean_j sisnr[:, perm[j], j]   (kept as (tb, 1, 1) tiles)
        scores = []
        for perm in perms:
            acc = sisnr[:, perm[0]:perm[0] + 1, 0:1]
            for j in range(1, S):
                acc = acc + sisnr[:, perm[j]:perm[j] + 1, j:j + 1]
            scores.append(acc * inv_S)                            # (tb, 1, 1)

        # max / argmax over permutations (strict '>' -> first max wins, like torch).
        best = scores[0]
        best_idx = jnp.zeros((tb, 1, 1), jnp.int32)
        for p in range(1, P):
            better = scores[p] > best
            best_idx = jnp.where(better, jnp.int32(p), best_idx)
            best = jnp.maximum(scores[p], best)

        best_ref[...] = best.astype(best_ref.dtype)               # (tb, 1, 1)
        perm_ref[...] = best_idx                                  # (tb, 1, 1)

    return kernel


def perm_invariant_sisdr(pr_batch, t_batch, *, n_sources, eps=1e-9,
                         zero_mean=False, backward_loss=True,
                         return_best_permutation=False, block_batch=None):
    """Pallas implementation of PermInvariantSISDR.forward (default config)."""
    # normalize_input: truncate to common length (wrapper glue).
    min_len = min(pr_batch.shape[-1], t_batch.shape[-1])
    # Kernel works in f32 (matches the PyTorch reference). If upstream data is
    # bf16 this astype could be dropped and the upcast done in-kernel instead.
    pr_batch = pr_batch[:, :, :min_len].astype(jnp.float32)
    t_batch = t_batch[:, :, :min_len].astype(jnp.float32)

    B, S, T = pr_batch.shape
    assert S == n_sources
    perms = list(itertools.permutations(range(n_sources)))

    # Choose TB (batch elements per grid step) against a conservative VMEM
    # budget: 2 inputs x double-buffered x TB*S*T*4 B, safe on v5e/v6e/v7x.
    if block_batch is None:
        budget = 8 * 1024 * 1024
        per_elem = 2 * S * T * 4 * 2
        block_batch = max(1, min(B, budget // per_elem, 128))
    TB = int(block_batch)
    # TODO(synk): for waveforms so long that even TB=1 overflows VMEM, add a
    # T grid axis accumulating cross/ppd/ttd partials in VMEM scratch.

    B_pad = ((B + TB - 1) // TB) * TB
    if B_pad != B:
        pad = B_pad - B
        zpad = jnp.zeros((pad, S, T), jnp.float32)
        pr_batch = jnp.concatenate([pr_batch, zpad], axis=0)
        t_batch = jnp.concatenate([t_batch, zpad], axis=0)
    nblk = B_pad // TB

    kernel = _make_sisdr_kernel(perms, n_sources, eps, zero_mean, TB, T)

    best, perm_ind = pl.pallas_call(
        kernel,
        out_shape=(jax.ShapeDtypeStruct((B_pad, 1, 1), jnp.float32),
                   jax.ShapeDtypeStruct((B_pad, 1, 1), jnp.int32)),
        grid=(nblk,),
        in_specs=[pl.BlockSpec((TB, S, T), lambda b: (b, 0, 0)),
                  pl.BlockSpec((TB, S, T), lambda b: (b, 0, 0))],
        out_specs=(pl.BlockSpec((TB, 1, 1), lambda b: (b, 0, 0)),
                   pl.BlockSpec((TB, 1, 1), lambda b: (b, 0, 0))),
        compiler_params=pltpu.CompilerParams(
            dimension_semantics=("parallel",),
            vmem_limit_bytes=32 * 1024 * 1024),
    )(pr_batch, t_batch)

    best = best.reshape(B_pad)[:B]
    perm_ind = perm_ind.reshape(B_pad)[:B]

    # return_individual_results=False -> mean over batch; backward_loss -> negate.
    loss = jnp.mean(best)
    if backward_loss:
        loss = -loss

    if return_best_permutation:
        perms_arr = jnp.asarray(perms, dtype=jnp.int32)
        return loss, perms_arr[perm_ind]
    return loss
    # TODO(synk): improvement=True branch (SISDRi with initial_mixtures) not
    # implemented; default config has improvement=False.


def _ref_forward(pr, t, n_sources, eps=1e-9):
    """Pure-JAX reference mirroring the PyTorch code path (default config)."""
    perms = list(itertools.permutations(range(n_sources)))
    ttd = jnp.sum(t * t, axis=-1, keepdims=True)
    cols = []
    for perm in perms:
        p = pr[:, list(perm), :]
        s_t = jnp.sum(p * t, axis=-1, keepdims=True) / (ttd + eps) * t
        e_t = p - s_t
        sisnr = 10.0 * jnp.log10(
            jnp.sum(s_t * s_t, axis=-1, keepdims=True)
            / (jnp.sum(e_t * e_t, axis=-1, keepdims=True) + eps))
        cols.append(sisnr)
    all_sisnrs = jnp.concatenate(cols, axis=-1)          # (B, S, P)
    scores = all_sisnrs.mean(-2)                          # (B, P)
    best = jnp.max(scores, axis=-1)                       # (B,)
    best_idx = jnp.argmax(scores, axis=-1)                # (B,)
    return -jnp.mean(best), best_idx


if __name__ == "__main__":
    B, S, T = 6, 3, 256   # batch, n_sources, waveform length
    key = jax.random.PRNGKey(0)
    k1, k2 = jax.random.split(key)
    pr = jax.random.normal(k1, (B, S, T), dtype=jnp.float32)
    t = jax.random.normal(k2, (B, S, T), dtype=jnp.float32)

    perms_arr = jnp.asarray(list(itertools.permutations(range(S))), jnp.int32)
    ref_loss, ref_idx = _ref_forward(pr, t, S)
    ref_loss = jax.block_until_ready(ref_loss)

    # Multi-step grid path (TB=4 -> B padded 6->8, 2 grid steps).
    loss, best_perms = perm_invariant_sisdr(
        pr, t, n_sources=S, return_best_permutation=True, block_batch=4)
    loss = jax.block_until_ready(loss)
    best_perms = jax.block_until_ready(best_perms)
    assert jnp.allclose(loss, ref_loss, rtol=1e-4, atol=1e-4), (loss, ref_loss)
    assert best_perms.shape == (B, S)
    assert bool(jnp.all(best_perms == perms_arr[ref_idx])), (best_perms, ref_idx)

    # Auto-chosen TB path (single grid step here).
    loss2 = jax.block_until_ready(perm_invariant_sisdr(pr, t, n_sources=S))
    assert jnp.allclose(loss2, ref_loss, rtol=1e-4, atol=1e-4), (loss2, ref_loss)

    print("KERNEL_OK")
</pallas_src>

<mosaic_0001>
module attributes {stable_mosaic.version = 11 : i64} {
  func.func @kernel(%arg0: i32, %arg1: memref<4x3x256xf32, #tpu.memory_space<vmem>>, %arg2: memref<4x3x256xf32, #tpu.memory_space<vmem>>, %arg3: memref<4x1x1xf32, #tpu.memory_space<vmem>>, %arg4: memref<4x1x1xi32, #tpu.memory_space<vmem>>) attributes {dimension_semantics = [#tpu.dimension_semantics<parallel>], iteration_bounds = array<i64: 2>, scalar_prefetch = 0 : i64, scratch_operands = 0 : i64, tpu.core_type = #tpu.core_type<tc>, window_params = [{transform_indices = @transform_0, window_bounds = array<i64: 4, 3, 256>}, {transform_indices = @transform_1, window_bounds = array<i64: 4, 3, 256>}, {transform_indices = @transform_2, window_bounds = array<i64: 4, 1, 1>}, {transform_indices = @transform_3, window_bounds = array<i64: 4, 1, 1>}]} {
    %c0 = arith.constant 0 : index
    %c0_0 = arith.constant 0 : index
    %c0_1 = arith.constant 0 : index
    %0 = vector.load %arg1[%c0, %c0_0, %c0_1] : memref<4x3x256xf32, #tpu.memory_space<vmem>>, vector<4x3x256xf32>
    %c0_2 = arith.constant 0 : index
    %c0_3 = arith.constant 0 : index
    %c0_4 = arith.constant 0 : index
    %1 = vector.load %arg2[%c0_2, %c0_3, %c0_4] : memref<4x3x256xf32, #tpu.memory_space<vmem>>, vector<4x3x256xf32>
    "tpu.trace_start"() <{level = 10 : i32, message = "bit,bjt->bij"}> : () -> ()
    %cst = arith.constant dense<0.000000e+00> : vector<4x3x3xf32>
    %2 = tpu.matmul %0, %1, %cst {dimension_numbers = #tpu.dot_dimension_numbers<[2], [2], [1], [1], [0, 0, 0, 1, 1, 1], [0], [0]>} : vector<4x3x256xf32>, vector<4x3x256xf32>, vector<4x3x3xf32> -> vector<4x3x3xf32>
    "tpu.trace_stop"() : () -> ()
    %3 = arith.mulf %1, %1 : vector<4x3x256xf32>
    %cst_5 = arith.constant dense<0.000000e+00> : vector<4x3xf32>
    %4 = vector.multi_reduction <add>, %3, %cst_5 [2] : vector<4x3x256xf32> to vector<4x3xf32>
    %5 = arith.mulf %0, %0 : vector<4x3x256xf32>
    %cst_6 = arith.constant dense<0.000000e+00> : vector<4x3xf32>
    %6 = vector.multi_reduction <add>, %5, %cst_6 [2] : vector<4x3x256xf32> to vector<4x3xf32>
    %7 = vector.shape_cast %4 : vector<4x3xf32> to vector<4x1x3xf32>
    %cst_7 = arith.constant 9.99999971E-10 : f32
    %8 = vector.broadcast %cst_7 : f32 to vector<4x1x3xf32>
    %9 = arith.addf %7, %8 : vector<4x1x3xf32>
    %10 = vector.broadcast %9 : vector<4x1x3xf32> to vector<4x3x3xf32>
    %11 = arith.divf %2, %10 : vector<4x3x3xf32>
    %12 = arith.mulf %11, %11 : vector<4x3x3xf32>
    %13 = vector.broadcast %7 : vector<4x1x3xf32> to vector<4x3x3xf32>
    %14 = arith.mulf %12, %13 : vector<4x3x3xf32>
    %15 = vector.shape_cast %6 : vector<4x3xf32> to vector<4x3x1xf32>
    %cst_8 = arith.constant 2.000000e+00 : f32
    %16 = vector.broadcast %cst_8 : f32 to vector<4x3x3xf32>
    %17 = arith.mulf %16, %11 : vector<4x3x3xf32>
    %18 = arith.mulf %17, %2 : vector<4x3x3xf32>
    %19 = vector.broadcast %15 : vector<4x3x1xf32> to vector<4x3x3xf32>
    %20 = arith.subf %19, %18 : vector<4x3x3xf32>
    %21 = arith.addf %20, %14 : vector<4x3x3xf32>
    %cst_9 = arith.constant 9.99999971E-10 : f32
    %22 = vector.broadcast %cst_9 : f32 to vector<4x3x3xf32>
    %23 = arith.addf %21, %22 : vector<4x3x3xf32>
    %24 = arith.divf %14, %23 : vector<4x3x3xf32>
    %25 = math.log %24 : vector<4x3x3xf32>
    %cst_10 = arith.constant 0.434294492 : f32
    %26 = vector.broadcast %cst_10 : f32 to vector<4x3x3xf32>
    %27 = arith.mulf %25, %26 : vector<4x3x3xf32>
    %cst_11 = arith.constant 1.000000e+01 : f32
    %28 = vector.broadcast %cst_11 : f32 to vector<4x3x3xf32>
    %29 = arith.mulf %28, %27 : vector<4x3x3xf32>
    %30 = vector.extract_strided_slice %29 {offsets = [0, 0, 0], sizes = [4, 1, 1], strides = [1, 1, 1]} : vector<4x3x3xf32> to vector<4x1x1xf32>
    %31 = vector.extract_strided_slice %29 {offsets = [0, 1, 1], sizes = [4, 1, 1], strides = [1, 1, 1]} : vector<4x3x3xf32> to vector<4x1x1xf32>
    %32 = arith.addf %30, %31 : vector<4x1x1xf32>
    %33 = vector.extract_strided_slice %29 {offsets = [0, 2, 2], sizes = [4, 1, 1], strides = [1, 1, 1]} : vector<4x3x3xf32> to vector<4x1x1xf32>
    %34 = arith.addf %32, %33 : vector<4x1x1xf32>
    %cst_12 = arith.constant 0.333333343 : f32
    %35 = vector.broadcast %cst_12 : f32 to vector<4x1x1xf32>
    %36 = arith.mulf %34, %35 : vector<4x1x1xf32>
    %37 = vector.extract_strided_slice %29 {offsets = [0, 0, 0], sizes = [4, 1, 1], strides = [1, 1, 1]} : vector<4x3x3xf32> to vector<4x1x1xf32>
    %38 = vector.extract_strided_slice %29 {offsets = [0, 2, 1], sizes = [4, 1, 1], strides = [1, 1, 1]} : vector<4x3x3xf32> to vector<4x1x1xf32>
    %39 = arith.addf %37, %38 : vector<4x1x1xf32>
    %40 = vector.extract_strided_slice %29 {offsets = [0, 1, 2], sizes = [4, 1, 1], strides = [1, 1, 1]} : vector<4x3x3xf32> to vector<4x1x1xf32>
    %41 = arith.addf %39, %40 : vector<4x1x1xf32>
    %cst_13 = arith.constant 0.333333343 : f32
    %42 = vector.broadcast %cst_13 : f32 to vector<4x1x1xf32>
    %43 = arith.mulf %41, %42 : vector<4x1x1xf32>
    %44 = vector.extract_strided_slice %29 {offsets = [0, 1, 0], sizes = [4, 1, 1], strides = [1, 1, 1]} : vector<4x3x3xf32> to vector<4x1x1xf32>
    %45 = vector.extract_strided_slice %29 {offsets = [0, 0, 1], sizes = [4, 1, 1], strides = [1, 1, 1]} : vector<4x3x3xf32> to vector<4x1x1xf32>
    %46 = arith.addf %44, %45 : vector<4x1x1xf32>
    %47 = vector.extract_strided_slice %29 {offsets = [0, 2, 2], sizes = [4, 1, 1], strides = [1, 1, 1]} : vector<4x3x3xf32> to vector<4x1x1xf32>
    %48 = arith.addf %46, %47 : vector<4x1x1xf32>
    %cst_14 = arith.constant 0.333333343 : f32
    %49 = vector.broadcast %cst_14 : f32 to vector<4x1x1xf32>
    %50 = arith.mulf %48, %49 : vector<4x1x1xf32>
    %51 = vector.extract_strided_slice %29 {offsets = [0, 1, 0], sizes = [4, 1, 1], strides = [1, 1, 1]} : vector<4x3x3xf32> to vector<4x1x1xf32>
    %52 = vector.extract_strided_slice %29 {offsets = [0, 2, 1], sizes = [4, 1, 1], strides = [1, 1, 1]} : vector<4x3x3xf32> to vector<4x1x1xf32>
    %53 = arith.addf %51, %52 : vector<4x1x1xf32>
    %54 = vector.extract_strided_slice %29 {offsets = [0, 0, 2], sizes = [4, 1, 1], strides = [1, 1, 1]} : vector<4x3x3xf32> to vector<4x1x1xf32>
    %55 = arith.addf %53, %54 : vector<4x1x1xf32>
    %cst_15 = arith.constant 0.333333343 : f32
    %56 = vector.broadcast %cst_15 : f32 to vector<4x1x1xf32>
    %57 = arith.mulf %55, %56 : vector<4x1x1xf32>
    %58 = vector.extract_strided_slice %29 {offsets = [0, 2, 0], sizes = [4, 1, 1], strides = [1, 1, 1]} : vector<4x3x3xf32> to vector<4x1x1xf32>
    %59 = vector.extract_strided_slice %29 {offsets = [0, 0, 1], sizes = [4, 1, 1], strides = [1, 1, 1]} : vector<4x3x3xf32> to vector<4x1x1xf32>
    %60 = arith.addf %58, %59 : vector<4x1x1xf32>
    %61 = vector.extract_strided_slice %29 {offsets = [0, 1, 2], sizes = [4, 1, 1], strides = [1, 1, 1]} : vector<4x3x3xf32> to vector<4x1x1xf32>
    %62 = arith.addf %60, %61 : vector<4x1x1xf32>
    %cst_16 = arith.constant 0.333333343 : f32
    %63 = vector.broadcast %cst_16 : f32 to vector<4x1x1xf32>
    %64 = arith.mulf %62, %63 : vector<4x1x1xf32>
    %65 = vector.extract_strided_slice %29 {offsets = [0, 2, 0], sizes = [4, 1, 1], strides = [1, 1, 1]} : vector<4x3x3xf32> to vector<4x1x1xf32>
    %66 = vector.extract_strided_slice %29 {offsets = [0, 1, 1], sizes = [4, 1, 1], strides = [1, 1, 1]} : vector<4x3x3xf32> to vector<4x1x1xf32>
    %67 = arith.addf %65, %66 : vector<4x1x1xf32>
    %68 = vector.extract_strided_slice %29 {offsets = [0, 0, 2], sizes = [4, 1, 1], strides = [1, 1, 1]} : vector<4x3x3xf32> to vector<4x1x1xf32>
    %69 = arith.addf %67, %68 : vector<4x1x1xf32>
    %cst_17 = arith.constant 0.333333343 : f32
    %70 = vector.broadcast %cst_17 : f32 to vector<4x1x1xf32>
    %71 = arith.mulf %69, %70 : vector<4x1x1xf32>
    %c0_i32 = arith.constant 0 : i32
    %72 = vector.broadcast %c0_i32 : i32 to vector<4x1x1xi32>
    %73 = arith.cmpf ogt, %43, %36 : vector<4x1x1xf32>
    %c1_i32 = arith.constant 1 : i32
    %74 = vector.broadcast %c1_i32 : i32 to vector<4x1x1xi32>
    %75 = arith.select %73, %74, %72 : vector<4x1x1xi1>, vector<4x1x1xi32>
    %76 = arith.maximumf %43, %36 : vector<4x1x1xf32>
    %77 = arith.cmpf ogt, %50, %76 : vector<4x1x1xf32>
    %c2_i32 = arith.constant 2 : i32
    %78 = vector.broadcast %c2_i32 : i32 to vector<4x1x1xi32>
    %79 = arith.select %77, %78, %75 : vector<4x1x1xi1>, vector<4x1x1xi32>
    %80 = arith.maximumf %50, %76 : vector<4x1x1xf32>
    %81 = arith.cmpf ogt, %57, %80 : vector<4x1x1xf32>
    %c3_i32 = arith.constant 3 : i32
    %82 = vector.broadcast %c3_i32 : i32 to vector<4x1x1xi32>
    %83 = arith.select %81, %82, %79 : vector<4x1x1xi1>, vector<4x1x1xi32>
    %84 = arith.maximumf %57, %80 : vector<4x1x1xf32>
    %85 = arith.cmpf ogt, %64, %84 : vector<4x1x1xf32>
    %c4_i32 = arith.constant 4 : i32
    %86 = vector.broadcast %c4_i32 : i32 to vector<4x1x1xi32>
    %87 = arith.select %85, %86, %83 : vector<4x1x1xi1>, vector<4x1x1xi32>
    %88 = arith.maximumf %64, %84 : vector<4x1x1xf32>
    %89 = arith.cmpf ogt, %71, %88 : vector<4x1x1xf32>
    %c5_i32 = arith.constant 5 : i32
    %90 = vector.broadcast %c5_i32 : i32 to vector<4x1x1xi32>
    %91 = arith.select %89, %90, %87 : vector<4x1x1xi1>, vector<4x1x1xi32>
    %92 = arith.maximumf %71, %88 : vector<4x1x1xf32>
    %c0_18 = arith.constant 0 : index
    %c0_19 = arith.constant 0 : index
    %c0_20 = arith.constant 0 : index
    %93 = vector.load %arg3[%c0_18, %c0_19, %c0_20] : memref<4x1x1xf32, #tpu.memory_space<vmem>>, vector<4x1x1xf32>
    tpu.vector_store %arg3[%c0_18, %c0_19, %c0_20], %92 {strides = array<i32>} : memref<4x1x1xf32, #tpu.memory_space<vmem>>, vector<4x1x1xf32>,
    %c0_21 = arith.constant 0 : index
    %c0_22 = arith.constant 0 : index
    %c0_23 = arith.constant 0 : index
    %94 = vector.load %arg4[%c0_21, %c0_22, %c0_23] : memref<4x1x1xi32, #tpu.memory_space<vmem>>, vector<4x1x1xi32>
    tpu.vector_store %arg4[%c0_21, %c0_22, %c0_23], %91 {strides = array<i32>} : memref<4x1x1xi32, #tpu.memory_space<vmem>>, vector<4x1x1xi32>,
    return
  }
  func.func @transform_0(%arg0: i32) -> (i32, i32, i32) {
    %c0_i32 = arith.constant 0 : i32
    %c0_i32_0 = arith.constant 0 : i32
    %c0_i32_1 = arith.constant 0 : i32
    return %arg0, %c0_i32, %c0_i32_0 : i32, i32, i32
  }
  func.func @transform_1(%arg0: i32) -> (i32, i32, i32) {
    %c0_i32 = arith.constant 0 : i32
    %c0_i32_0 = arith.constant 0 : i32
    %c0_i32_1 = arith.constant 0 : i32
    return %arg0, %c0_i32, %c0_i32_0 : i32, i32, i32
  }
  func.func @transform_2(%arg0: i32) -> (i32, i32, i32) {
    %c0_i32 = arith.constant 0 : i32
    %c0_i32_0 = arith.constant 0 : i32
    %c0_i32_1 = arith.constant 0 : i32
    return %arg0, %c0_i32, %c0_i32_0 : i32, i32, i32
  }
  func.func @transform_3(%arg0: i32) -> (i32, i32, i32) {
    %c0_i32 = arith.constant 0 : i32
    %c0_i32_0 = arith.constant 0 : i32
    %c0_i32_1 = arith.constant 0 : i32
    return %arg0, %c0_i32, %c0_i32_0 : i32, i32, i32
  }
}

</mosaic_0001>

<bundles_post_ra>
// kernel: tpu_custom_call.1
= control target key start
LH: loop header
LB: loop body
LE: loop exit
PB: predicated region body
PF: predicated region fallthrough
CT: control target
= control target key end

     0   :  { %s1182_s12 = smov 0   ;;  %s1352_s0 = inlined_call_operand.vmem [shape: f32[8,3,256], index: 0, kind: input, shape index: {}]   ;;  %s1353_s1 = inlined_call_operand.vmem [shape: f32[8,3,256], index: 1, kind: input, shape index: {}]   ;;  %s1354_s2 = inlined_call_operand.vmem [shape: f32[8,1,1], index: 2, kind: output, shape index: {0}]   ;;  %s1355_s3 = inlined_call_operand.vmem [shape: s32[8,1,1], index: 3, kind: output, shape index: {1}]  }
   0x1 LB: > { %s1091_s13 = sadd.s32 4294967295, %s1157_s12   ;;  %p1095_p0 = scmp.ge.s32.totalorder %s1157_s12, 1  ;;  %s1157_s12 = sphi %s1182_s12, %s14_s12  }
   0x2   : > { %p154_p1 = scmp.lt.s32.totalorder %s1157_s12, 3 }
   0x4   : > { %p155_p2 = pnand %p1095_p0, %p154_p1 }
   0x5   : > { %s1096_s14 = sshll.u32 (!%p155_p2), %s1091_s13, 2  ;;  %vm540_vm0 = vcmask (!%p155_p2), 1042432   ;;  %v605_v57 = vlaneseq (!%p155_p2)  ;;  %s1159_s22 = smov (!%p155_p2), 127   ;;  %vm992_vm5 = vcmask (!%p155_p2), 2050  }
   0x6   : > { %158 = sbr.rel (%p155_p2) target bundleno = 468 (0x1d4), region = 28  ;;  %p189_p3 = scmp.lt.s32.totalorder (!%p155_p2), %s1096_s14, 7 }
   0x7   : > { %v606_v59 = vand.u32 (!%p155_p2), 127, %v605_v57  ;;  %v608_v60 = vshrl.u32 (!%p155_p2), %v605_v57, 7  ;;  %s1160_s23 = smov (!%p155_p2), 126  }
   0xd   : > { %s1357_s14 = smov (!%p189_p3, %s1096_s14), 7 }
   0xe   : > { %s1106_s15 = sshll.u32 %s1357_s14, 3  ;;  %s1308_s26 = scalar_lea.vmem %s1354_s2, %s1357_s14 }
   0xf   : > { %s200_s18 = scalar_lea.vmem %s1353_s1, %s1106_s15  ;;  %s193_s21 = scalar_lea.vmem %s1352_s0, %s1106_s15 }
  0x10   : > { %v216_v0 = vld [vmem:[%s200_s18] sm:$0x77]  ;;  %v217_v1 = vld [vmem:[%s200_s18 + $0x8] sm:$0x77]  ;;  %v218_v7 = vld [vmem:[%s200_s18 + $0x10] sm:$0x77]  ;;  %s1314_s29 = scalar_lea.vmem %s1355_s3, %s1357_s14 }
  0x11   : > { %v212_v2 = vld [vmem:[%s193_s21] sm:$0x77]  ;;  %v224_v3 = vcombine.high %v216_v0, %v216_v0  ;;  %v300_v4 = vcombine.high %v217_v1, %v217_v1  ;;  %v213_v6 = vld [vmem:[%s193_s21 + $0x8] sm:$0x77]  ;;  %v219_v8 = vld [vmem:[%s200_s18 + $0x18] sm:$0x77]  ;;  %v524_v9 = vmul.f32 %v216_v0, %v216_v0  ;;  %v376_v11 = vcombine.high %v218_v7, %v218_v7 }
  0x12   : > { %v221_v5 = vcombine.high %v212_v2, %v212_v2  ;;  %v297_v10 = vcombine.high %v213_v6, %v213_v6  ;;  %v452_v12 = vcombine.high %v219_v8, %v219_v8  ;;  %v214_v13 = vld [vmem:[%s193_s21 + $0x10] sm:$0x77]  ;;  %v215_v14 = vld [vmem:[%s193_s21 + $0x18] sm:$0x77]  ;;  %v526_v15 = vmul.f32 %v218_v7, %v218_v7 }
  0x13   : > { %226 = vmatprep.subr.mxu0 %v224_v3  ;;  %302 = vmatprep.subr.mxu1 %v300_v4  ;;  %v373_v16 = vcombine.high %v214_v13, %v214_v13  ;;  %v449_v17 = vcombine.high %v215_v14, %v215_v14  ;;  %v532_v18 = vcombine.high %v524_v9, %v524_v9  ;;  %v541_v19 = vsel %vm540_vm0, %v524_v9, 0.0 }
  0x14   : > { %227 = vmatpush1.xpose.msra.mxu0 %v216_v0  ;;  %303 = vmatpush1.xpose.msra.mxu1 %v217_v1  ;;  %v534_v20 = vcombine.high %v526_v15, %v526_v15  ;;  %v551_v21 = vsel %vm540_vm0, %v526_v15, 0.0  ;;  %v525_v22 = vmul.f32 %v217_v1, %v217_v1  ;;  %v527_v23 = vmul.f32 %v219_v8, %v219_v8 }
  0x15   : > { %290 = vmatprep.mubr.f32.mxu0 %v221_v5  ;;  %366 = vmatprep.mubr.f32.mxu1 %v297_v10  ;;  %v542_v24 = vsel %vm540_vm0, %v532_v18, 0.0  ;;  %v562_v25 = vmul.f32 %v213_v6, %v213_v6  ;;  %v561_v26 = vmul.f32 %v212_v2, %v212_v2  ;;  %v564_v27 = vmul.f32 %v215_v14, %v215_v14 }
  0x16   : > { %378 = vmatprep.subr.mxu0 %v376_v11  ;;  %454 = vmatprep.subr.mxu1 %v452_v12  ;;  %v543_v28 = vadd.f32 %v542_v24, %v541_v19  ;;  %v552_v29 = vsel %vm540_vm0, %v534_v20, 0.0  ;;  %v533_v30 = vcombine.high %v525_v22, %v525_v22  ;;  %v546_v31 = vsel %vm540_vm0, %v525_v22, 0.0 }
  0x17   : > { %291 = vmatmul.mubr.f32.vlgmr.msra.gmra.mrb[0].mxu0 %v212_v2  ;;  %367 = vmatmul.mubr.f32.vlgmr.msra.gmra.mrb[0].mxu1 %v213_v6  ;;  %v553_v32 = vadd.f32 %v552_v29, %v551_v21  ;;  %v535_v33 = vcombine.high %v527_v23, %v527_v23  ;;  %v556_v34 = vsel %vm540_vm0, %v527_v23, 0.0  ;;  %v570_v35 = vcombine.high %v562_v25, %v562_v25 }
  0x18   : > { %379 = vmatpush1.xpose.msra.mxu0 %v218_v7  ;;  %455 = vmatpush1.xpose.msra.mxu1 %v219_v8  ;;  %v547_v36 = vsel %vm540_vm0, %v533_v30, 0.0  ;;  %v569_v37 = vcombine.high %v561_v26, %v561_v26  ;;  %v582_v41 = vsel %vm540_vm0, %v562_v25, 0.0  ;;  %v577_v42 = vsel %vm540_vm0, %v561_v26, 0.0 }
  0x19   : > { %442 = vmatprep.mubr.f32.mxu0 %v373_v16  ;;  %518 = vmatprep.mubr.f32.mxu1 %v449_v17  ;;  %v557_v38 = vsel %vm540_vm0, %v535_v33, 0.0  ;;  %v548_v39 = vadd.f32 %v547_v36, %v546_v31  ;;  %v583_v43 = vsel %vm540_vm0, %v570_v35, 0.0  ;;  %v572_v45 = vcombine.high %v564_v27, %v564_v27 }
  0x1a   : > { %544 = vadd.xlane.f32.xlu0 %v543_v28  ;;  %554 = vadd.xlane.f32.xlu1 %v553_v32  ;;  %v558_v40 = vadd.f32 %v557_v38, %v556_v34  ;;  %v578_v44 = vsel %vm540_vm0, %v569_v37, 0.0  ;;  %v563_v46 = vmul.f32 %v214_v13, %v214_v13  ;;  %v584_v48 = vadd.f32 %v583_v43, %v582_v41 }
  0x1b   : > { %443 = vmatmul.mubr.f32.vlgmr.msra.gmra.mrb[2].mxu0 %v214_v13  ;;  %519 = vmatmul.mubr.f32.vlgmr.msra.gmra.mrb[2].mxu1 %v215_v14  ;;  %v579_v49 = vadd.f32 %v578_v44, %v577_v42  ;;  %v592_v50 = vsel %vm540_vm0, %v564_v27, 0.0  ;;  %v593_v51 = vsel %vm540_vm0, %v572_v45, 0.0  ;;  %v1215_v0 = vsub.s32 %v606_v59, %v608_v60 }
  0x1c   : > { %v571_v47 = vcombine.high %v563_v46, %v563_v46  ;;  %v587_v52 = vsel %vm540_vm0, %v563_v46, 0.0  ;;  %v594_v54 = vadd.f32 %v593_v51, %v592_v50 }
  0x1e   : > { %549 = vadd.xlane.f32.xlu0 %v548_v39  ;;  %559 = vadd.xlane.f32.xlu1 %v558_v40  ;;  %v588_v53 = vsel %vm540_vm0, %v571_v47, 0.0 }
  0x1f   : > { %v589_v55 = vadd.f32 %v588_v53, %v587_v52 }
  0x22   : > { %585 = vadd.xlane.f32.xlu1 %v584_v48  ;;  %580 = vadd.xlane.f32.xlu0 %v579_v49 }
  0x26   : > { %595 = vadd.xlane.f32.xlu1 %v594_v54  ;;  %590 = vadd.xlane.f32.xlu0 %v589_v55 }
  0xa7   : > { %v545_v56 = vpop.xlane.xlu0 %544  ;;  %v555_v58 = vpop.xlane.xlu1 %554 }
  0xa8   : > { %v597_v62 = vadd.f32 1e-09, %v545_v56  ;;  %v599_v3 = vadd.f32 1e-09, %v555_v58  ;;  %v651_v32 = vrot.slane %v545_v56, %v1215_v0  ;;  %v659_v42 = vrot.slane %v555_v58, %v1215_v0 }
  0xaa   : > { %v610_v2 = vrot.slane %v597_v62, %v1215_v0  ;;  %v618_v6 = vrot.slane %v599_v3, %v1215_v0 }
  0xab   : > { %v550_v61 = vpop.xlane.xlu0 %549  ;;  %v1217_v1 = vpop.xlane.xlu1 %559 }
  0xac   : > { %v598_v63 = vadd.f32 1e-09, %v550_v61  ;;  %v600_v5 = vadd.f32 1e-09, %v1217_v1  ;;  %1127 = vrcp.f32 %v610_v2  ;;  %v655_v33 = vrot.slane %v550_v61, %v1215_v0 }
  0xad   : > { %v663_v50 = vrot.slane %v1217_v1, %v1215_v0 }
  0xae   : > { %v614_v4 = vrot.slane %v598_v63, %v1215_v0  ;;  %v622_v7 = vrot.slane %v600_v5, %v1215_v0 }
  0xaf   : > { %v581_v18 = vpop.xlane.xlu0 %580  ;;  %v586_v21 = vpop.xlane.xlu1 %585 }
  0xb0   : > { %1129 = vrcp.f32 %v614_v4 }
  0xb1   : > { %1131 = vrcp.f32 %v618_v6 }
  0xb2   : > { %1133 = vrcp.f32 %v622_v7 }
  0xb3   : > { %v591_v41 = vpop.xlane.xlu0 %590  ;;  %v596_v47 = vpop.xlane.xlu1 %595 }
  0xb6   : > { %v1128_v8 = vpop.eup %1127 }
  0xba   : > { %v1130_v9 = vpop.eup %1129 }
  0xbb   : > { %v1132_v12 = vpop.eup %1131 }
  0xbc   : > { %v1134_v17 = vpop.eup %1133 }
  0xea   : > { %v292_v10 = vpop.f32.mrb[0].mxu0  ;;  %v368_v11 = vpop.f32.mrb[0].mxu1 }
  0xeb   : > { %v633_v13 = vmul.f32 %v1128_v8, %v292_v10  ;;  %v635_v14 = vmul.f32 %v1130_v9, %v368_v11  ;;  %v294_v15 = vpop.f32.mrb[1].mxu0  ;;  %v370_v16 = vpop.f32.mrb[1].mxu1 }
  0xed   : > { %v676_v19 = vmul.f32 2.0, %v633_v13  ;;  %v677_v20 = vmul.f32 2.0, %v635_v14  ;;  %v640_v22 = vmul.f32 %v633_v13, %v633_v13  ;;  %v641_v23 = vmul.f32 %v635_v14, %v635_v14 }
  0xee   : > { %v444_v24 = vpop.f32.mrb[2].mxu0  ;;  %v520_v25 = vpop.f32.mrb[2].mxu1 }
  0xef   : > { %v680_v26 = vmul.f32 %v676_v19, %v292_v10  ;;  %v681_v27 = vmul.f32 %v677_v20, %v368_v11  ;;  %v637_v28 = vmul.f32 %v1132_v12, %v444_v24  ;;  %v639_v29 = vmul.f32 %v1134_v17, %v520_v25  ;;  %v446_v30 = vpop.f32.mrb[3].mxu0  ;;  %v522_v31 = vpop.f32.mrb[3].mxu1 }
  0xf0   : > { %v673_v37 = vmul.f32 %v655_v33, %v641_v23  ;;  %v672_v39 = vmul.f32 %v651_v32, %v640_v22 }
  0xf1   : > { %v642_v34 = vmul.f32 %v637_v28, %v637_v28  ;;  %v678_v35 = vmul.f32 2.0, %v637_v28  ;;  %v679_v36 = vmul.f32 2.0, %v639_v29  ;;  %v685_v38 = vsub.f32 %v586_v21, %v681_v27 }
  0xf2   : > { %v684_v40 = vsub.f32 %v581_v18, %v680_v26  ;;  %v643_v51 = vmul.f32 %v639_v29, %v639_v29 }
  0xf3   : > { %v682_v43 = vmul.f32 %v678_v35, %v444_v24  ;;  %v683_v44 = vmul.f32 %v679_v36, %v520_v25  ;;  %v689_v45 = vadd.f32 %v685_v38, %v673_v37  ;;  %v674_v48 = vmul.f32 %v659_v42, %v642_v34 }
  0xf4   : > { %v688_v46 = vadd.f32 %v684_v40, %v672_v39  ;;  %v675_v57 = vmul.f32 %v663_v50, %v643_v51 }
  0xf5   : > { %v686_v49 = vsub.f32 %v591_v41, %v682_v43  ;;  %v693_v52 = vadd.f32 1e-09, %v689_v45  ;;  %v687_v55 = vsub.f32 %v596_v47, %v683_v44 }
  0xf6   : > { %v692_v53 = vadd.f32 1e-09, %v688_v46 }
  0xf7   : > { %v690_v54 = vadd.f32 %v686_v49, %v674_v48  ;;  %1135 = vrcp.f32 %v693_v52  ;;  %v691_v58 = vadd.f32 %v687_v55, %v675_v57 }
  0xf8   : > { %1137 = vrcp.f32 %v692_v53 }
  0xf9   : > { %v694_v56 = vadd.f32 1e-09, %v690_v54  ;;  %v695_v59 = vadd.f32 1e-09, %v691_v58 }
  0xfb   : > { %1139 = vrcp.f32 %v694_v56 }
  0xfc   : > { %1141 = vrcp.f32 %v695_v59 }
 0x101   : > { %v1136_v60 = vpop.eup %1135 }
 0x102   : > { %v1138_v61 = vpop.eup %1137  ;;  %v699_v62 = vmul.f32 %v1136_v60, %v673_v37 }
 0x103   : > { %v697_v63 = vmul.f32 %v1138_v61, %v672_v39 }
 0x104   : > { %1143 = vlog2.f32 %v699_v62 }
 0x105   : > { %1145 = vlog2.f32 %v697_v63  ;;  %v1140_v0 = vpop.eup %1139  ;;  %v1161_v63 = vmov 0  }
 0x106   : > { %v701_v1 = vmul.f32 %v1140_v0, %v674_v48  ;;  %v1142_v2 = vpop.eup %1141 }
 0x107   : > { %v703_v7 = vmul.f32 %v1142_v2, %v675_v57 }
 0x108   : > { %1147 = vlog2.f32 %v701_v1 }
 0x109   : > { %1149 = vlog2.f32 %v703_v7 }
 0x10e   : > { %v1144_v3 = vpop.eup %1143 }
 0x10f   : > { %v1146_v4 = vpop.eup %1145  ;;  %v707_v5 = vmul.f32 0.6931472, %v1144_v3 }
 0x110   : > { %v705_v6 = vmul.f32 0.6931472, %v1146_v4 }
 0x111   : > { %v713_v8 = vmul.f32 0.4342945, %v707_v5 }
 0x112   : > { %v712_v9 = vmul.f32 0.4342945, %v705_v6  ;;  %v1148_v14 = vpop.eup %1147 }
 0x113   : > { %v1231_v11 = vmul.f32 10.0, %v713_v8  ;;  %v709_v15 = vmul.f32 0.6931472, %v1148_v14  ;;  %v1150_v20 = vpop.eup %1149 }
 0x114   : > { %v1229_v10 = vmul.f32 10.0, %v712_v9  ;;  %v711_v21 = vmul.f32 0.6931472, %v1150_v20 }
 0x115   : > { %v725_v16 = vrot.slane %v1231_v11, 1  ;;  %v714_v18 = vmul.f32 0.4342945, %v709_v15  ;;  %v745_v19 = vrot.slane %v1231_v11, 2  ;;  %v805_v29 = vrot.slane %v1231_v11, 7 }
 0x116   : > { %v744_v12 = vrot.slane %v1229_v10, 2  ;;  %v724_v13 = vrot.slane %v1229_v10, 1  ;;  %v804_v17 = vrot.slane %v1229_v10, 7  ;;  %v852_v23 = vrot.slane %v1229_v10, 6 }
 0x117   : > { %v1244_v22 = vmul.f32 10.0, %v714_v18  ;;  %v715_v24 = vmul.f32 0.4342945, %v711_v21  ;;  %v853_v31 = vrot.slane %v1231_v11, 6 }
 0x118   : > { %768 = vrot.lane.b32.xlu1 %v744_v12, %s1159_s22  ;;  %728 = vrot.lane.b32.xlu0 %v724_v13, %s1159_s22 }
 0x119   : > { %v726_v25 = vrot.slane %v1244_v22, 1  ;;  %v1252_v26 = vmul.f32 10.0, %v715_v24  ;;  %v746_v27 = vrot.slane %v1244_v22, 2  ;;  %v806_v32 = vrot.slane %v1244_v22, 7 }
 0x11a   : > { %v854_v34 = vrot.slane %v1244_v22, 6 }
 0x11b   : > { %v727_v28 = vrot.slane %v1252_v26, 1  ;;  %v747_v30 = vrot.slane %v1252_v26, 2  ;;  %v807_v33 = vrot.slane %v1252_v26, 7  ;;  %v855_v35 = vrot.slane %v1252_v26, 6 }
 0x11c   : > { %730 = vrot.lane.b32.xlu1 %v725_v16, %s1159_s22  ;;  %808 = vrot.lane.b32.xlu0 %v804_v17, %s1159_s22 }
 0x120   : > { %770 = vrot.lane.b32.xlu1 %v745_v19, %s1159_s22  ;;  %832 = vrot.lane.b32.xlu0 %v804_v17, %s1160_s23 }
 0x124   : > { %748 = vrot.lane.b32.xlu1 %v744_v12, %s1160_s23  ;;  %880 = vrot.lane.b32.xlu0 %v852_v23, %s1160_s23 }
 0x128   : > { %784 = vrot.lane.b32.xlu1 %v724_v13, %s1160_s23  ;;  %732 = vrot.lane.b32.xlu0 %v726_v25, %s1159_s22 }
 0x12c   : > { %750 = vrot.lane.b32.xlu1 %v745_v19, %s1160_s23  ;;  %772 = vrot.lane.b32.xlu0 %v746_v27, %s1159_s22 }
 0x130   : > { %786 = vrot.lane.b32.xlu1 %v725_v16, %s1160_s23  ;;  %734 = vrot.lane.b32.xlu0 %v727_v28, %s1159_s22 }
 0x134   : > { %810 = vrot.lane.b32.xlu1 %v805_v29, %s1159_s22  ;;  %774 = vrot.lane.b32.xlu0 %v747_v30, %s1159_s22 }
 0x138   : > { %834 = vrot.lane.b32.xlu1 %v805_v29, %s1160_s23  ;;  %752 = vrot.lane.b32.xlu0 %v746_v27, %s1160_s23 }
 0x13c   : > { %856 = vrot.lane.b32.xlu1 %v852_v23, %s1159_s22  ;;  %790 = vrot.lane.b32.xlu0 %v727_v28, %s1160_s23 }
 0x140   : > { %858 = vrot.lane.b32.xlu1 %v853_v31, %s1159_s22  ;;  %812 = vrot.lane.b32.xlu0 %v806_v32, %s1159_s22 }
 0x144   : > { %788 = vrot.lane.b32.xlu1 %v726_v25, %s1160_s23  ;;  %836 = vrot.lane.b32.xlu0 %v806_v32, %s1160_s23 }
 0x148   : > { %754 = vrot.lane.b32.xlu1 %v747_v30, %s1160_s23  ;;  %838 = vrot.lane.b32.xlu0 %v807_v33, %s1160_s23 }
 0x14c   : > { %814 = vrot.lane.b32.xlu1 %v807_v33, %s1159_s22  ;;  %860 = vrot.lane.b32.xlu0 %v854_v34, %s1159_s22 }
 0x150   : > { %882 = vrot.lane.b32.xlu1 %v853_v31, %s1160_s23  ;;  %884 = vrot.lane.b32.xlu0 %v854_v34, %s1160_s23 }
 0x154   : > { %862 = vrot.lane.b32.xlu1 %v855_v35, %s1159_s22 }
 0x158   : > { %886 = vrot.lane.b32.xlu1 %v855_v35, %s1160_s23 }
 0x18a   : > { %v769_v36 = vpop.permute.xlu1 %768  ;;  %v729_v37 = vpop.permute.xlu0 %728 }
 0x18b   : > { %v780_v44 = vadd.f32 %v769_v36, %v1229_v10  ;;  %v740_v45 = vadd.f32 %v729_v37, %v1229_v10 }
 0x18e   : > { %v731_v38 = vpop.permute.xlu1 %730  ;;  %v809_v39 = vpop.permute.xlu0 %808 }
 0x18f   : > { %v820_v54 = vadd.f32 %v809_v39, %v1229_v10  ;;  %v741_v1 = vadd.f32 %v731_v38, %v1231_v11 }
 0x192   : > { %v771_v40 = vpop.permute.xlu1 %770  ;;  %v833_v41 = vpop.permute.xlu0 %832 }
 0x193   : > { %v781_v59 = vadd.f32 %v771_v40, %v1231_v11  ;;  %v844_v2 = vadd.f32 %v833_v41, %v740_v45 }
 0x195   : > { %v848_v13 = vmul.f32 0.33333334, %v844_v2 }
 0x196   : > { %v749_v42 = vpop.permute.xlu1 %748  ;;  %v881_v43 = vpop.permute.xlu0 %880 }
 0x197   : > { %v760_v49 = vadd.f32 %v749_v42, %v740_v45  ;;  %v892_v15 = vadd.f32 %v881_v43, %v820_v54 }
 0x199   : > { %v764_v53 = vmul.f32 0.33333334, %v760_v49  ;;  %v896_v29 = vmul.f32 0.33333334, %v892_v15 }
 0x19a   : > { %v785_v46 = vpop.permute.xlu1 %784  ;;  %v733_v47 = vpop.permute.xlu0 %732 }
 0x19b   : > { %v796_v48 = vadd.f32 %v785_v46, %v780_v44  ;;  %v824_v58 = vadd.f32 %v820_v54, %v785_v46  ;;  %v742_v34 = vadd.f32 %v733_v47, %v1244_v22 }
 0x19d   : > { %v800_v50 = vmul.f32 0.33333334, %v796_v48  ;;  %v828_v3 = vmul.f32 0.33333334, %v824_v58 }
 0x19e   : > { %v751_v51 = vpop.permute.xlu1 %750  ;;  %v773_v52 = vpop.permute.xlu0 %772 }
 0x19f   : > { %v908_v55 = vmax.f32 %v800_v50, %v764_v53  ;;  %vm900_vm1 = vcmp.gt.f32.partialorder %v800_v50, %v764_v53  ;;  %v761_v7 = vadd.f32 %v751_v51, %v741_v1  ;;  %v782_v35 = vadd.f32 %v773_v52, %v1244_v22 }
 0x1a0   : > { %v904_v0 = vsel %vm900_vm1, 1, %v1161_v63 }
 0x1a1   : > { %v916_v60 = vrot.slane %v908_v55, 7  ;;  %v928_v5 = vrot.slane %v904_v0, 7  ;;  %v765_v17 = vmul.f32 0.33333334, %v761_v7 }
 0x1a2   : > { %v787_v56 = vpop.permute.xlu1 %786  ;;  %v1288_v57 = vpop.permute.xlu0 %734 }
 0x1a3   : > { %v797_v4 = vadd.f32 %v787_v56, %v781_v59  ;;  %v936_v6 = vmax.f32 %v828_v3, %v916_v60  ;;  %vm924_vm2 = vcmp.gt.f32.partialorder %v828_v3, %v916_v60  ;;  %v743_v55 = vadd.f32 %v1288_v57, %v1252_v26 }
 0x1a4   : > { %v932_v16 = vsel %vm924_vm2, 2, %v928_v5 }
 0x1a5   : > { %v801_v14 = vmul.f32 0.33333334, %v797_v4  ;;  %vm940_vm3 = vcmp.gt.f32.partialorder %v848_v13, %v936_v6  ;;  %v948_v21 = vmax.f32 %v848_v13, %v936_v6 }
 0x1a6   : > { %v811_v61 = vpop.permute.xlu1 %810  ;;  %v775_v62 = vpop.permute.xlu0 %774  ;;  %v944_v25 = vsel %vm940_vm3, 3, %v932_v16 }
 0x1a7   : > { %v1294_v8 = vadd.f32 %v811_v61, %v1231_v11  ;;  %v909_v24 = vmax.f32 %v801_v14, %v765_v17  ;;  %vm901_vm4 = vcmp.gt.f32.partialorder %v801_v14, %v765_v17  ;;  %v956_v33 = vrot.slane %v948_v21, 7 }
 0x1a8   : > { %v968_v37 = vrot.slane %v944_v25, 7  ;;  %v783_v39 = vadd.f32 %v775_v62, %v1252_v26 }
 0x1a9   : > { %v825_v18 = vadd.f32 %v1294_v8, %v787_v56  ;;  %v917_v38 = vrot.slane %v909_v24, 7 }
 0x1aa   : > { %v835_v9 = vpop.permute.xlu1 %834  ;;  %v753_v12 = vpop.permute.xlu0 %752 }
 0x1ab   : > { %v845_v27 = vadd.f32 %v835_v9, %v741_v1  ;;  %v829_v30 = vmul.f32 0.33333334, %v825_v18 }
 0x1ad   : > { %v849_v40 = vmul.f32 0.33333334, %v845_v27  ;;  %v937_v43 = vmax.f32 %v829_v30, %v917_v38  ;;  %vm925_vm7 = vcmp.gt.f32.partialorder %v829_v30, %v917_v38 }
 0x1ae   : > { %v857_v19 = vpop.permute.xlu1 %856  ;;  %v1297_v20 = vpop.permute.xlu0 %790 }
 0x1af   : > { %v868_v23 = vadd.f32 %v857_v19, %v1229_v10  ;;  %v905_v10 = vsel %vm901_vm4, 1, %v1161_v63  ;;  %v799_v53 = vadd.f32 %v1297_v20, %v783_v39  ;;  %vm941_vm9 = vcmp.gt.f32.partialorder %v849_v40, %v937_v43 }
 0x1b0   : > { %v929_v51 = vrot.slane %v905_v10, 7  ;;  %v949_v59 = vmax.f32 %v849_v40, %v937_v43 }
 0x1b1   : > { %v872_v28 = vadd.f32 %v868_v23, %v833_v41  ;;  %v762_v41 = vadd.f32 %v753_v12, %v742_v34  ;;  %v803_v3 = vmul.f32 0.33333334, %v799_v53 }
 0x1b2   : > { %v859_v31 = vpop.permute.xlu1 %858  ;;  %v813_v32 = vpop.permute.xlu0 %812  ;;  %v933_v58 = vsel %vm925_vm7, 2, %v929_v51  ;;  %v957_v14 = vrot.slane %v949_v59, 7 }
 0x1b3   : > { %v876_v36 = vmul.f32 0.33333334, %v872_v28  ;;  %v869_v45 = vadd.f32 %v859_v31, %v1231_v11  ;;  %v822_v46 = vadd.f32 %v813_v32, %v1244_v22  ;;  %v766_v56 = vmul.f32 0.33333334, %v762_v41 }
 0x1b4   : > { %v945_v13 = vsel %vm941_vm9, 3, %v933_v58 }
 0x1b5   : > { %vm964_vm6 = vcmp.gt.f32.partialorder %v876_v36, %v956_v33  ;;  %v976_v42 = vmax.f32 %v876_v36, %v956_v33  ;;  %v873_v60 = vadd.f32 %v869_v45, %v835_v9  ;;  %v969_v25 = vrot.slane %v945_v13, 7 }
 0x1b6   : > { %v972_v44 = vsel %vm964_vm6, 4, %v968_v37  ;;  %v789_v47 = vpop.permute.xlu1 %788  ;;  %v837_v48 = vpop.permute.xlu0 %836 }
 0x1b7   : > { %vm980_vm8 = vcmp.gt.f32.partialorder %v896_v29, %v976_v42  ;;  %v988_v49 = vmax.f32 %v896_v29, %v976_v42  ;;  %v798_v50 = vadd.f32 %v789_v47, %v782_v35  ;;  %v826_v54 = vadd.f32 %v822_v46, %v789_v47 }
 0x1b8   : > { %v984_v52 = vsel %vm980_vm8, 5, %v972_v44  ;;  %v846_v1 = vadd.f32 %v837_v48, %v742_v34  ;;  %v877_v9 = vmul.f32 0.33333334, %v873_v60 }
 0x1b9   : > { %993 = vst.msk [vmem:[%s1308_s26 - $0x2] sm:$0x4] %vm992_vm5, %v988_v49  ;;  %997 = vst.msk [vmem:[%s1314_s29 - $0x2] sm:$0x4] %vm992_vm5, %v984_v52  ;;  %v802_v11 = vmul.f32 0.33333334, %v798_v50 }
 0x1ba   : > { %v755_v61 = vpop.permute.xlu1 %754  ;;  %v1325_v62 = vpop.permute.xlu0 %838  ;;  %v830_v4 = vmul.f32 0.33333334, %v826_v54  ;;  %v850_v18 = vmul.f32 0.33333334, %v846_v1  ;;  %vm965_vm14 = vcmp.gt.f32.partialorder %v877_v9, %v957_v14  ;;  %v977_v41 = vmax.f32 %v877_v9, %v957_v14 }
 0x1bb   : > { %vm902_vm10 = vcmp.gt.f32.partialorder %v802_v11, %v766_v56  ;;  %v910_v0 = vmax.f32 %v802_v11, %v766_v56  ;;  %v763_v2 = vadd.f32 %v755_v61, %v743_v55  ;;  %v847_v12 = vadd.f32 %v1325_v62, %v743_v55 }
 0x1bc   : > { %v906_v57 = vsel %vm902_vm10, 1, %v1161_v63  ;;  %v973_v45 = vsel %vm965_vm14, 4, %v969_v25 }
 0x1bd   : > { %v918_v5 = vrot.slane %v910_v0, 7  ;;  %v930_v6 = vrot.slane %v906_v57, 7  ;;  %v767_v7 = vmul.f32 0.33333334, %v763_v2  ;;  %v851_v28 = vmul.f32 0.33333334, %v847_v12 }
 0x1be   : > { %v815_v15 = vpop.permute.xlu1 %814  ;;  %v861_v16 = vpop.permute.xlu0 %860 }
 0x1bf   : > { %vm926_vm11 = vcmp.gt.f32.partialorder %v830_v4, %v918_v5  ;;  %v938_v17 = vmax.f32 %v830_v4, %v918_v5  ;;  %vm903_vm12 = vcmp.gt.f32.partialorder %v803_v3, %v767_v7  ;;  %v911_v21 = vmax.f32 %v803_v3, %v767_v7 }
 0x1c0   : > { %v934_v19 = vsel %vm926_vm11, 2, %v930_v6  ;;  %v823_v23 = vadd.f32 %v815_v15, %v1252_v26  ;;  %v870_v24 = vadd.f32 %v861_v16, %v1244_v22  ;;  %v907_v30 = vsel %vm903_vm12, 1, %v1161_v63 }
 0x1c1   : > { %vm942_vm13 = vcmp.gt.f32.partialorder %v850_v18, %v938_v17  ;;  %v950_v27 = vmax.f32 %v850_v18, %v938_v17  ;;  %v919_v38 = vrot.slane %v911_v21, 7  ;;  %v931_v40 = vrot.slane %v907_v30, 7 }
 0x1c2   : > { %v946_v29 = vsel %vm942_vm13, 3, %v934_v19  ;;  %v827_v31 = vadd.f32 %v823_v23, %v1297_v20  ;;  %v874_v32 = vadd.f32 %v870_v24, %v837_v48  ;;  %v883_v33 = vpop.permute.xlu1 %882  ;;  %v885_v34 = vpop.permute.xlu0 %884 }
 0x1c3   : > { %v958_v35 = vrot.slane %v950_v27, 7  ;;  %v970_v36 = vrot.slane %v946_v29, 7  ;;  %v893_v37 = vadd.f32 %v883_v33, %v1294_v8  ;;  %v894_v10 = vadd.f32 %v885_v34, %v822_v46 }
 0x1c4   : > { %v831_v22 = vmul.f32 0.33333334, %v827_v31  ;;  %v878_v39 = vmul.f32 0.33333334, %v874_v32 }
 0x1c5   : > { %v897_v42 = vmul.f32 0.33333334, %v893_v37  ;;  %v898_v43 = vmul.f32 0.33333334, %v894_v10 }
 0x1c6   : > { %vm927_vm15 = vcmp.gt.f32.partialorder %v831_v22, %v919_v38  ;;  %v939_v63 = vmax.f32 %v831_v22, %v919_v38  ;;  %vm966_vm0 = vcmp.gt.f32.partialorder %v878_v39, %v958_v35  ;;  %v978_v20 = vmax.f32 %v878_v39, %v958_v35  ;;  %v863_v44 = vpop.permute.xlu1 %862 }
 0x1c7   : > { %vm981_vm1 = vcmp.gt.f32.partialorder %v897_v42, %v977_v41  ;;  %v989_v8 = vmax.f32 %v897_v42, %v977_v41  ;;  %v974_v46 = vsel %vm966_vm0, 4, %v970_v36  ;;  %v935_v47 = vsel %vm927_vm15, 2, %v931_v40 }
 0x1c8   : > { %vm943_vm2 = vcmp.gt.f32.partialorder %v851_v28, %v939_v63  ;;  %v985_v48 = vsel %vm981_vm1, 5, %v973_v45  ;;  %vm982_vm3 = vcmp.gt.f32.partialorder %v898_v43, %v978_v20  ;;  %v951_v49 = vmax.f32 %v851_v28, %v939_v63 }
 0x1c9   : > { %994 = vst.msk [vmem:[%s1308_s26 - $0x1] sm:$0x4] %vm992_vm5, %v989_v8  ;;  %998 = vst.msk [vmem:[%s1314_s29 - $0x1] sm:$0x4] %vm992_vm5, %v985_v48  ;;  %v986_v50 = vsel %vm982_vm3, 5, %v974_v46  ;;  %v990_v51 = vmax.f32 %v898_v43, %v978_v20  ;;  %v871_v52 = vadd.f32 %v863_v44, %v1252_v26  ;;  %v947_v54 = vsel %vm943_vm2, 3, %v935_v47 }
 0x1ca   : > { %999 = vst.msk [vmem:[%s1314_s29] sm:$0x4] %vm992_vm5, %v986_v50  ;;  %v887_v53 = vpop.permute.xlu1 %886  ;;  %v959_v58 = vrot.slane %v951_v49, 7  ;;  %v971_v60 = vrot.slane %v947_v54, 7 }
 0x1cb   : > { %995 = vst.msk [vmem:[%s1308_s26] sm:$0x4] %vm992_vm5, %v990_v51  ;;  %v875_v55 = vadd.f32 %v871_v52, %v1325_v62  ;;  %v895_v56 = vadd.f32 %v887_v53, %v823_v23 }
 0x1cd   : > { %v879_v11 = vmul.f32 0.33333334, %v875_v55  ;;  %v899_v59 = vmul.f32 0.33333334, %v895_v56 }
 0x1cf   : > { %vm967_vm4 = vcmp.gt.f32.partialorder %v879_v11, %v959_v58  ;;  %v979_v61 = vmax.f32 %v879_v11, %v959_v58 }
 0x1d0   : > { %v975_v0 = vsel %vm967_vm4, 4, %v971_v60 }
 0x1d1   : > { %vm983_vm6 = vcmp.gt.f32.partialorder %v899_v59, %v979_v61  ;;  %v991_v26 = vmax.f32 %v899_v59, %v979_v61 }
 0x1d2   : > { %v987_v1 = vsel %vm983_vm6, 5, %v975_v0 }
 0x1d3   : > { %996 = vst.msk [vmem:[%s1308_s26 + $0x1] sm:$0x4] %vm992_vm5, %v991_v26  ;;  %1000 = vst.msk [vmem:[%s1314_s29 + $0x1] sm:$0x4] %vm992_vm5, %v987_v1 }
 0x1d4 PF: > { %s14_s12 = sadd.s32 1, %s1157_s12  }
 0x1d5   : > { %p11_p4 = scmp.ge.s32.totalorder %s14_s12, 4  }
 0x1d7   :  { %13 = sbr.rel (!%p11_p4) target bundleno = 1 (0x1), region = 73 }

</bundles_post_ra>
